<compile_context>
chip_gen: v7x
topology: tpu7x:2x2x1
jax: 0.10.0
libtpu: 0.0.40
codegen_flags: <defaults>
</compile_context>

<pallas_src>
import jax
import jax.numpy as jnp
from jax.experimental import pallas as pl
from jax.experimental.pallas import tpu as pltpu

PACK = 8  # logical rows packed per vreg row (lane-packing factor)


def viper_kernel(x_ref, w1_ref, b1_ref, w2_ref, b2_ref, wq_ref, bq_ref, q_ref):
    # x tile is lane-packed: (tb, PACK*in_size). Weights are block-diagonal,
    # so each packed row is 8 independent MLP evaluations.
    x = x_ref[...].astype(w1_ref.dtype)
    h1 = jnp.dot(x, w1_ref[...], preferred_element_type=jnp.float32) + b1_ref[...]
    h1 = jnp.maximum(h1, 0.0)
    h2 = jnp.dot(h1.astype(w2_ref.dtype), w2_ref[...],
                 preferred_element_type=jnp.float32) + b2_ref[...]
    h2 = jnp.maximum(h2, 0.0)
    # fused dueling head: value/advantage/mean-centering pre-folded into wq/bq
    q = jnp.dot(h2.astype(wq_ref.dtype), wq_ref[...],
                preferred_element_type=jnp.float32) + bq_ref[...]
    q_ref[...] = q.astype(q_ref.dtype)


def _fold_dueling_heads(wv, bv, wa, ba):
    """Fold q = v + (a - mean(a)) into a single affine map of the features.

    v       = h @ wv + bv
    a       = h @ wa + ba
    mean(a) = h @ row_mean(wa) + mean(ba)
    =>  q   = h @ (wa + wv - row_mean(wa)) + (ba + bv - mean(ba))
    Exact up to floating-point reordering (~1e-6 vs. the PyTorch op order).
    """
    w_q = wa + (wv - jnp.mean(wa, axis=1, keepdims=True))   # (H, O)
    b_q = ba + (bv - jnp.mean(ba, axis=1, keepdims=True))   # (1, O)
    return w_q, b_q


def _block_diag(w, pack):
    """(k, n) -> (pack*k, pack*n) block-diagonal replication (exact)."""
    return jnp.kron(jnp.eye(pack, dtype=w.dtype), w)


def _round_up(n, m):
    return ((n + m - 1) // m) * m


def viper_forward(x, params, *, block_rows=2048, matmul_dtype=None):
    """Fused dueling-MLP forward.

    x: (B, input_size) float32.  block_rows = packed-row tile (x PACK logical
    rows); default 2048 packed rows = 16384 logical rows (~1 MiB x tiles).
    """
    B, in_size = x.shape
    hidden = params["w1"].shape[1]
    out_size = params["wa"].shape[1]

    # ---- one-time (per call) weight preparation: fold head + lane-pack ----
    w_q, b_q = _fold_dueling_heads(params["wv"], params["bv"],
                                   params["wa"], params["ba"])
    w1 = _block_diag(params["w1"], PACK)      # (PACK*in,  PACK*H)
    w2 = _block_diag(params["w2"], PACK)      # (PACK*H,   PACK*H)
    wq = _block_diag(w_q, PACK)               # (PACK*H,   PACK*O)
    b1 = jnp.tile(params["b1"], (1, PACK))    # (1, PACK*H)
    b2 = jnp.tile(params["b2"], (1, PACK))    # (1, PACK*H)
    bq = jnp.tile(b_q, (1, PACK))             # (1, PACK*O)

    if matmul_dtype is not None:
        # Cast only the resident weights; x/h are cast in-kernel after the DMA
        # so no extra HBM pass is added on the dominant x stream.
        w1, w2, wq = (a.astype(matmul_dtype) for a in (w1, w2, wq))

    # ---- lane-pack the batch: 8 logical rows per packed row (free reshape) --
    pad = (-B) % PACK
    if pad:
        x = jnp.pad(x, ((0, pad), (0, 0)))
    Bp = x.shape[0] // PACK
    xp = x.reshape(Bp, PACK * in_size)

    # ---- batch tiling of packed rows ----
    if Bp <= block_rows:
        if Bp >= 16:
            # split into >=2 steps so v7x can shard the batch over its 2 TCs.
            tb = min(_round_up(pl.cdiv(Bp, 2), 8), Bp)
        else:
            tb = Bp                       # single full-extent block
    else:
        tb = _round_up(block_rows, 8)     # multiple of 8 (sublane rule)
    grid = (pl.cdiv(Bp, tb),)             # tail block (if any) is masked

    Kx, H, O = PACK * in_size, PACK * hidden, PACK * out_size
    batch_map = lambda i: (i, 0)
    fixed_map = lambda i: (0, 0)          # weights stay resident in VMEM

    qp = pl.pallas_call(
        viper_kernel,
        out_shape=jax.ShapeDtypeStruct((Bp, O), jnp.float32),
        grid=grid,
        in_specs=[
            pl.BlockSpec((tb, Kx), batch_map),
            pl.BlockSpec(w1.shape, fixed_map),
            pl.BlockSpec(b1.shape, fixed_map),
            pl.BlockSpec(w2.shape, fixed_map),
            pl.BlockSpec(b2.shape, fixed_map),
            pl.BlockSpec(wq.shape, fixed_map),
            pl.BlockSpec(bq.shape, fixed_map),
        ],
        out_specs=pl.BlockSpec((tb, O), batch_map),
        compiler_params=pltpu.CompilerParams(
            dimension_semantics=("parallel",)),   # v7x: shard batch over 2 TCs
    )(xp, w1, b1, w2, b2, wq, bq)

    # un-pack (contiguous => free) and drop padding rows
    q = qp.reshape(Bp * PACK, out_size)
    return q[:B]


def init_params(key, input_size, hidden_size, output_size):
    """Deterministic synthetic init (uniform, PyTorch-Linear-style bounds).

    Weights stored as (in_features, out_features) = transpose of nn.Linear.
    """
    def linear(k, fan_in, fan_out):
        kw, kb = jax.random.split(k)
        bound = 1.0 / jnp.sqrt(fan_in)
        w = jax.random.uniform(kw, (fan_in, fan_out), jnp.float32, -bound, bound)
        b = jax.random.uniform(kb, (1, fan_out), jnp.float32, -bound, bound)
        return w, b

    k1, k2, k3, k4 = jax.random.split(key, 4)
    w1, b1 = linear(k1, input_size, hidden_size)
    w2, b2 = linear(k2, hidden_size, hidden_size)
    wv, bv = linear(k3, hidden_size, 1)
    wa, ba = linear(k4, hidden_size, output_size)
    return dict(w1=w1, b1=b1, w2=w2, b2=b2, wv=wv, bv=bv, wa=wa, ba=ba)


def viper_reference(x, p):
    """Plain-JAX reference matching the original PyTorch forward exactly."""
    hi = jax.lax.Precision.HIGHEST
    h1 = jnp.maximum(jnp.dot(x, p["w1"], precision=hi) + p["b1"], 0.0)
    h2 = jnp.maximum(jnp.dot(h1, p["w2"], precision=hi) + p["b2"], 0.0)
    v = jnp.dot(h2, p["wv"], precision=hi) + p["bv"]
    a = jnp.dot(h2, p["wa"], precision=hi) + p["ba"]
    return v + (a - a.mean(axis=1, keepdims=True))


if __name__ == "__main__":
    input_size, hidden_size, output_size = 16, 32, 4

    key = jax.random.PRNGKey(0)
    kp, k1, k2, k3, k4 = jax.random.split(key, 5)
    params = init_params(kp, input_size, hidden_size, output_size)

    def check(x, **kw):
        q = jax.block_until_ready(viper_forward(x, params, **kw))
        q_ref = viper_reference(x, params)
        assert q.shape == q_ref.shape
        assert jnp.allclose(q, q_ref, atol=1e-4, rtol=1e-4), \
            f"mismatch vs reference (B={x.shape[0]}, kw={kw})"
        return q

    # tiny batch (pads 2 -> 8, single packed block)
    check(jax.random.normal(k1, (2, input_size), jnp.float32))

    # multiple of PACK, single block
    check(jax.random.normal(k2, (16, input_size), jnp.float32))

    # non-multiple-of-8 batch exercising the padding + un-pack/slice path
    check(jax.random.normal(k3, (70, input_size), jnp.float32))

    # multi-step pipelined grid (Bp=32 -> 2 parallel steps) and a forced
    # small block with a masked partial tail block (Bp=25, tb=8, grid=(4,))
    xbig = jax.random.normal(k4, (256, input_size), jnp.float32)
    check(xbig)
    check(xbig[:200], block_rows=8)

    print("KERNEL_OK")
</pallas_src>

<mosaic_0001>
module attributes {stable_mosaic.version = 11 : i64} {
  func.func @viper_kernel(%arg0: i32, %arg1: memref<1x128xf32, #tpu.memory_space<vmem>>, %arg2: memref<128x256xf32, #tpu.memory_space<vmem>>, %arg3: memref<1x256xf32, #tpu.memory_space<vmem>>, %arg4: memref<256x256xf32, #tpu.memory_space<vmem>>, %arg5: memref<1x256xf32, #tpu.memory_space<vmem>>, %arg6: memref<256x32xf32, #tpu.memory_space<vmem>>, %arg7: memref<1x32xf32, #tpu.memory_space<vmem>>, %arg8: memref<1x32xf32, #tpu.memory_space<vmem>>) attributes {dimension_semantics = [#tpu.dimension_semantics<parallel>], iteration_bounds = array<i64: 1>, scalar_prefetch = 0 : i64, scratch_operands = 0 : i64, tpu.core_type = #tpu.core_type<tc>, window_params = [{transform_indices = @transform_0, window_bounds = array<i64: 1, 128>}, {pipeline_mode = #tpu.pipeline_mode<synchronous>, transform_indices = @transform_1, window_bounds = array<i64: 128, 256>}, {pipeline_mode = #tpu.pipeline_mode<synchronous>, transform_indices = @transform_2, window_bounds = array<i64: 1, 256>}, {pipeline_mode = #tpu.pipeline_mode<synchronous>, transform_indices = @transform_3, window_bounds = array<i64: 256, 256>}, {pipeline_mode = #tpu.pipeline_mode<synchronous>, transform_indices = @transform_4, window_bounds = array<i64: 1, 256>}, {pipeline_mode = #tpu.pipeline_mode<synchronous>, transform_indices = @transform_5, window_bounds = array<i64: 256, 32>}, {pipeline_mode = #tpu.pipeline_mode<synchronous>, transform_indices = @transform_6, window_bounds = array<i64: 1, 32>}, {transform_indices = @transform_7, window_bounds = array<i64: 1, 32>}]} {
    %c0 = arith.constant 0 : index
    %c0_0 = arith.constant 0 : index
    %0 = vector.load %arg1[%c0, %c0_0] : memref<1x128xf32, #tpu.memory_space<vmem>>, vector<1x128xf32>
    %c0_1 = arith.constant 0 : index
    %c0_2 = arith.constant 0 : index
    %1 = vector.load %arg2[%c0_1, %c0_2] : memref<128x256xf32, #tpu.memory_space<vmem>>, vector<128x256xf32>
    %cst = arith.constant dense<0.000000e+00> : vector<1x256xf32>
    %2 = tpu.matmul %0, %1, %cst {dimension_numbers = #tpu.dot_dimension_numbers<[1], [0], [0], [1], [0, 0, 1, 1], [], []>} : vector<1x128xf32>, vector<128x256xf32>, vector<1x256xf32> -> vector<1x256xf32>
    %c0_3 = arith.constant 0 : index
    %c0_4 = arith.constant 0 : index
    %3 = vector.load %arg3[%c0_3, %c0_4] : memref<1x256xf32, #tpu.memory_space<vmem>>, vector<1x256xf32>
    %4 = arith.addf %2, %3 : vector<1x256xf32>
    %cst_5 = arith.constant 0.000000e+00 : f32
    %5 = vector.broadcast %cst_5 : f32 to vector<1x256xf32>
    %6 = arith.maximumf %4, %5 : vector<1x256xf32>
    %c0_6 = arith.constant 0 : index
    %c0_7 = arith.constant 0 : index
    %7 = vector.load %arg4[%c0_6, %c0_7] : memref<256x256xf32, #tpu.memory_space<vmem>>, vector<256x256xf32>
    %cst_8 = arith.constant dense<0.000000e+00> : vector<1x256xf32>
    %8 = tpu.matmul %6, %7, %cst_8 {dimension_numbers = #tpu.dot_dimension_numbers<[1], [0], [0], [1], [0, 0, 1, 1], [], []>} : vector<1x256xf32>, vector<256x256xf32>, vector<1x256xf32> -> vector<1x256xf32>
    %c0_9 = arith.constant 0 : index
    %c0_10 = arith.constant 0 : index
    %9 = vector.load %arg5[%c0_9, %c0_10] : memref<1x256xf32, #tpu.memory_space<vmem>>, vector<1x256xf32>
    %10 = arith.addf %8, %9 : vector<1x256xf32>
    %cst_11 = arith.constant 0.000000e+00 : f32
    %11 = vector.broadcast %cst_11 : f32 to vector<1x256xf32>
    %12 = arith.maximumf %10, %11 : vector<1x256xf32>
    %c0_12 = arith.constant 0 : index
    %c0_13 = arith.constant 0 : index
    %13 = vector.load %arg6[%c0_12, %c0_13] : memref<256x32xf32, #tpu.memory_space<vmem>>, vector<256x32xf32>
    %cst_14 = arith.constant dense<0.000000e+00> : vector<1x32xf32>
    %14 = tpu.matmul %12, %13, %cst_14 {dimension_numbers = #tpu.dot_dimension_numbers<[1], [0], [0], [1], [0, 0, 1, 1], [], []>} : vector<1x256xf32>, vector<256x32xf32>, vector<1x32xf32> -> vector<1x32xf32>
    %c0_15 = arith.constant 0 : index
    %c0_16 = arith.constant 0 : index
    %15 = vector.load %arg7[%c0_15, %c0_16] : memref<1x32xf32, #tpu.memory_space<vmem>>, vector<1x32xf32>
    %16 = arith.addf %14, %15 : vector<1x32xf32>
    %c0_17 = arith.constant 0 : index
    %c0_18 = arith.constant 0 : index
    %17 = vector.load %arg8[%c0_17, %c0_18] : memref<1x32xf32, #tpu.memory_space<vmem>>, vector<1x32xf32>
    tpu.vector_store %arg8[%c0_17, %c0_18], %16 {strides = array<i32>} : memref<1x32xf32, #tpu.memory_space<vmem>>, vector<1x32xf32>,
    return
  }
  func.func @transform_0(%arg0: i32) -> (i32, i32) {
    %c0_i32 = arith.constant 0 : i32
    %c0_i32_0 = arith.constant 0 : i32
    return %arg0, %c0_i32 : i32, i32
  }
  func.func @transform_1(%arg0: i32) -> (i32, i32) {
    %c0_i32 = arith.constant 0 : i32
    %c0_i32_0 = arith.constant 0 : i32
    %c0_i32_1 = arith.constant 0 : i32
    return %c0_i32, %c0_i32_0 : i32, i32
  }
  func.func @transform_2(%arg0: i32) -> (i32, i32) {
    %c0_i32 = arith.constant 0 : i32
    %c0_i32_0 = arith.constant 0 : i32
    %c0_i32_1 = arith.constant 0 : i32
    return %c0_i32, %c0_i32_0 : i32, i32
  }
  func.func @transform_3(%arg0: i32) -> (i32, i32) {
    %c0_i32 = arith.constant 0 : i32
    %c0_i32_0 = arith.constant 0 : i32
    %c0_i32_1 = arith.constant 0 : i32
    return %c0_i32, %c0_i32_0 : i32, i32
  }
  func.func @transform_4(%arg0: i32) -> (i32, i32) {
    %c0_i32 = arith.constant 0 : i32
    %c0_i32_0 = arith.constant 0 : i32
    %c0_i32_1 = arith.constant 0 : i32
    return %c0_i32, %c0_i32_0 : i32, i32
  }
  func.func @transform_5(%arg0: i32) -> (i32, i32) {
    %c0_i32 = arith.constant 0 : i32
    %c0_i32_0 = arith.constant 0 : i32
    %c0_i32_1 = arith.constant 0 : i32
    return %c0_i32, %c0_i32_0 : i32, i32
  }
  func.func @transform_6(%arg0: i32) -> (i32, i32) {
    %c0_i32 = arith.constant 0 : i32
    %c0_i32_0 = arith.constant 0 : i32
    %c0_i32_1 = arith.constant 0 : i32
    return %c0_i32, %c0_i32_0 : i32, i32
  }
  func.func @transform_7(%arg0: i32) -> (i32, i32) {
    %c0_i32 = arith.constant 0 : i32
    %c0_i32_0 = arith.constant 0 : i32
    return %arg0, %c0_i32 : i32, i32
  }
}

</mosaic_0001>

<bundles_post_ra>
// kernel: tpu_custom_call.1
= control target key start
LH: loop header
LB: loop body
LE: loop exit
PB: predicated region body
PF: predicated region fallthrough
CT: control target
= control target key end

     0   :  { %12 = vsyncpa [#allocation3], 0  ;;  %s917_s0 = inlined_call_operand.vmem [shape: f32[1,128], index: 0, kind: input, shape index: {}]   ;;  %s918_s1 = inlined_call_operand.vmem [shape: f32[128,256], index: 1, kind: input, shape index: {}]   ;;  %s919_s2 = inlined_call_operand.vmem [shape: f32[1,256], index: 2, kind: input, shape index: {}]   ;;  %s920_s3 = inlined_call_operand.hbm [shape: f32[256,256], index: 3, kind: input, shape index: {}]   ;;  %s921_s4 = inlined_call_operand.vmem [shape: f32[1,256], index: 4, kind: input, shape index: {}]   ;;  %s922_s5 = inlined_call_operand.vmem [shape: f32[256,32], index: 5, kind: input, shape index: {}]   ;;  %s923_s6 = inlined_call_operand.vmem [shape: f32[1,32], index: 6, kind: input, shape index: {}]   ;;  %s924_s7 = inlined_call_operand.hbm [shape: f32[1,32], index: 7, kind: output, shape index: {}]  }
   0x1   :  { %13 = vsyncpa [#allocation4], 0  ;;  %s644_s24 = smov [#allocation2]   ;;  %s596_s28 = scalar_lea.hbm %s920_s3, 8192 }
   0x2   :  { %s25_s25 = sshll.u32 %s644_s24, 4  ;;  %p597_p0 = scmp.ne.s32.totalorder %s920_s3, %s596_s28  ;;  %s26_s25 = int_to_ptr.vmem [resolvable:$true] %s25_s25 }
   0x3   :  { %p600_p1 = scmp.lt.u32.totalorder %s596_s28, %s920_s3 }
   0x5   :  { %p602_p2 = pnand %p600_p1, %p597_p0 }
   0x7   :  { %605 = shalt.err (!%p602_p2)
}
   0x8   :  { %s606_s10 = scalar_lea.vmem %s26_s25, 8192  ;;  %p611_p4 = scmp.lt.s32.totalorder %s26_s25, %s26_s25 }
   0x9   :  { %p607_p3 = scmp.ne.s32.totalorder %s26_s25, %s606_s10  ;;  %p612_p5 = scmp.lt.s32.totalorder %s606_s10, %s606_s10 }
   0xb   :  { %p613_p6 = por %p612_p5, %p611_p4 }
   0xd   :  { %p614_p7 = pnand %p613_p6, %p607_p3 }
   0xf   :  { %617 = shalt.err (!%p614_p7)
}
  0x10   :  { %s645_s11 = smov 256   ;;  %s646_s12 = smov 16  }
  0x11   :  { %31 = dma.hbm_to_vmem [thread:$0]  %s920_s3, 8192, %s26_s25, [#allocation3], %s645_s11, %s645_s11, %s646_s12  }
  0x12   :  { %640 = dma.done.wait [#allocation3], 8192  }
  0x13   :  { %641 = vsyncadd [#allocation3], 4294959104  ;;  %v647_v0 = vmov 0.0   ;;  %v43_v1 = vld [vmem:[%s918_s1 + $0x8] sm:$0xff]  ;;  %v45_v2 = vld [vmem:[%s918_s1 + $0x18] sm:$0xff]  ;;  %s648_s3 = smov [#allocation5]  }
  0x14   :  { %150 = vmatprep.mubr.f32.mxu0 %v647_v0  ;;  %v42_v3 = vld [vmem:[%s918_s1] sm:$0xff]  ;;  %v463_v4 = vpack.c.bf16 %v45_v2, %v43_v1  ;;  %v44_v5 = vld [vmem:[%s918_s1 + $0x10] sm:$0xff]  ;;  %v47_v6 = vld [vmem:[%s918_s1 + $0x28] sm:$0xff]  ;;  %s419_s23 = sshll.u32 %s648_s3, 4  ;;  %vm411_vm0 = vcmask 253952   ;;  %s420_s23 = int_to_ptr.vmem [resolvable:$true] %s419_s23 }
  0x15   :  { %v49_v7 = vld [vmem:[%s918_s1 + $0x38] sm:$0xff]  ;;  %v465_v8 = vpack.c.bf16 %v44_v5, %v42_v3  ;;  %v46_v10 = vld [vmem:[%s918_s1 + $0x20] sm:$0xff]  ;;  %v48_v11 = vld [vmem:[%s918_s1 + $0x30] sm:$0xff]  ;;  %s622_s24 = scalar_lea.vmem %s420_s23, 32  ;;  %p623_p9 = scmp.lt.s32.totalorder %s420_s23, %s420_s23 }
  0x16   :  { %v467_v9 = vpack.c.bf16 %v49_v7, %v47_v6  ;;  %v51_v12 = vld [vmem:[%s918_s1 + $0x48] sm:$0xff]  ;;  %464 = vmatprep.subr.bf16.mxu0 %v463_v4  ;;  %v53_v13 = vld [vmem:[%s918_s1 + $0x58] sm:$0xff]  ;;  %v469_v14 = vpack.c.bf16 %v48_v11, %v46_v10  ;;  %v50_v16 = vld [vmem:[%s918_s1 + $0x40] sm:$0xff] }
  0x17   :  { %466 = vmatpush1.bf16.msra.mxu0 %v465_v8  ;;  %v471_v15 = vpack.c.bf16 %v53_v13, %v51_v12  ;;  %v52_v17 = vld [vmem:[%s918_s1 + $0x50] sm:$0xff]  ;;  %v55_v18 = vld [vmem:[%s918_s1 + $0x68] sm:$0xff]  ;;  %v57_v19 = vld [vmem:[%s918_s1 + $0x78] sm:$0xff] }
  0x18   :  { %468 = vmatprep.subr.bf16.mxu0 %v467_v9  ;;  %v473_v20 = vpack.c.bf16 %v52_v17, %v50_v16  ;;  %v475_v21 = vpack.c.bf16 %v57_v19, %v55_v18  ;;  %v54_v22 = vld [vmem:[%s918_s1 + $0x60] sm:$0xff]  ;;  %v56_v23 = vld [vmem:[%s918_s1 + $0x70] sm:$0xff]  ;;  %v59_v24 = vld [vmem:[%s918_s1 + $0x88] sm:$0xff] }
  0x19   :  { %v61_v25 = vld [vmem:[%s918_s1 + $0x98] sm:$0xff]  ;;  %v58_v26 = vld [vmem:[%s918_s1 + $0x80] sm:$0xff]  ;;  %v60_v27 = vld [vmem:[%s918_s1 + $0x90] sm:$0xff]  ;;  %v477_v31 = vpack.c.bf16 %v56_v23, %v54_v22 }
  0x1a   :  { %v160_v28 = vld [vmem:[#allocation2 + $0x8] sm:$0xff]  ;;  %v162_v29 = vld [vmem:[#allocation2 + $0x18] sm:$0xff]  ;;  %v159_v30 = vld [vmem:[#allocation2] sm:$0xff]  ;;  %v479_v36 = vpack.c.bf16 %v61_v25, %v59_v24  ;;  %v481_v46 = vpack.c.bf16 %v60_v27, %v58_v26 }
  0x1b   :  { %470 = vmatpush1.bf16.msra.mxu0 %v469_v14  ;;  %v495_v32 = vpack.c.bf16 %v162_v29, %v160_v28  ;;  %v161_v33 = vld [vmem:[#allocation2 + $0x10] sm:$0xff]  ;;  %v164_v34 = vld [vmem:[#allocation2 + $0x28] sm:$0xff]  ;;  %v166_v35 = vld [vmem:[#allocation2 + $0x38] sm:$0xff] }
  0x1c   :  { %472 = vmatprep.subr.bf16.mxu0 %v471_v15  ;;  %v497_v37 = vpack.c.bf16 %v161_v33, %v159_v30  ;;  %v499_v38 = vpack.c.bf16 %v166_v35, %v164_v34  ;;  %v163_v39 = vld [vmem:[#allocation2 + $0x20] sm:$0xff]  ;;  %v165_v40 = vld [vmem:[#allocation2 + $0x30] sm:$0xff]  ;;  %v168_v41 = vld [vmem:[#allocation2 + $0x48] sm:$0xff] }
  0x1d   :  { %v63_v42 = vld [vmem:[%s918_s1 + $0xa8] sm:$0xff]  ;;  %v65_v43 = vld [vmem:[%s918_s1 + $0xb8] sm:$0xff]  ;;  %496 = vmatprep.subr.bf16.mxu1 %v495_v32  ;;  %v501_v45 = vpack.c.bf16 %v165_v40, %v163_v39  ;;  %v62_v47 = vld [vmem:[%s918_s1 + $0xa0] sm:$0xff] }
  0x1e   :  { %v170_v44 = vld [vmem:[#allocation2 + $0x58] sm:$0xff]  ;;  %498 = vmatpush1.bf16.msra.mxu1 %v497_v37  ;;  %v167_v49 = vld [vmem:[#allocation2 + $0x40] sm:$0xff]  ;;  %v169_v50 = vld [vmem:[#allocation2 + $0x50] sm:$0xff]  ;;  %v483_v51 = vpack.c.bf16 %v65_v43, %v63_v42 }
  0x1f   :  { %474 = vmatpush1.bf16.msra.mxu0 %v473_v20  ;;  %500 = vmatprep.subr.bf16.mxu1 %v499_v38  ;;  %v503_v48 = vpack.c.bf16 %v170_v44, %v168_v41  ;;  %v64_v52 = vld [vmem:[%s918_s1 + $0xb0] sm:$0xff]  ;;  %v172_v53 = vld [vmem:[#allocation2 + $0x68] sm:$0xff]  ;;  %v174_v54 = vld [vmem:[#allocation2 + $0x78] sm:$0xff]  ;;  %v505_v57 = vpack.c.bf16 %v169_v50, %v167_v49 }
  0x20   :  { %476 = vmatprep.subr.bf16.mxu0 %v475_v21  ;;  %v67_v55 = vld [vmem:[%s918_s1 + $0xc8] sm:$0xff]  ;;  %v69_v56 = vld [vmem:[%s918_s1 + $0xd8] sm:$0xff]  ;;  %v485_v58 = vpack.c.bf16 %v64_v52, %v62_v47  ;;  %v66_v59 = vld [vmem:[%s918_s1 + $0xc0] sm:$0xff]  ;;  %v507_v60 = vpack.c.bf16 %v174_v54, %v172_v53 }
  0x21   :  { %v171_v61 = vld [vmem:[#allocation2 + $0x60] sm:$0xff]  ;;  %v173_v62 = vld [vmem:[#allocation2 + $0x70] sm:$0xff]  ;;  %v487_v63 = vpack.c.bf16 %v69_v56, %v67_v55  ;;  %v176_v1 = vld [vmem:[#allocation2 + $0x88] sm:$0xff] }
  0x22   :  { %502 = vmatpush1.bf16.msra.mxu1 %v501_v45  ;;  %v68_v0 = vld [vmem:[%s918_s1 + $0xd0] sm:$0xff]  ;;  %v178_v2 = vld [vmem:[#allocation2 + $0x98] sm:$0xff]  ;;  %v71_v3 = vld [vmem:[%s918_s1 + $0xe8] sm:$0xff]  ;;  %v509_v5 = vpack.c.bf16 %v173_v62, %v171_v61 }
  0x23   :  { %478 = vmatpush1.bf16.msra.mxu0 %v477_v31  ;;  %504 = vmatprep.subr.bf16.mxu1 %v503_v48  ;;  %v73_v4 = vld [vmem:[%s918_s1 + $0xf8] sm:$0xff]  ;;  %v489_v6 = vpack.c.bf16 %v68_v0, %v66_v59  ;;  %v70_v7 = vld [vmem:[%s918_s1 + $0xe0] sm:$0xff]  ;;  %v511_v8 = vpack.c.bf16 %v178_v2, %v176_v1  ;;  %v177_v10 = vld [vmem:[#allocation2 + $0x90] sm:$0xff] }
  0x24   :  { %480 = vmatprep.subr.bf16.mxu0 %v479_v36  ;;  %v175_v9 = vld [vmem:[#allocation2 + $0x80] sm:$0xff]  ;;  %v491_v11 = vpack.c.bf16 %v73_v4, %v71_v3  ;;  %v72_v12 = vld [vmem:[%s918_s1 + $0xf0] sm:$0xff]  ;;  %v180_v13 = vld [vmem:[#allocation2 + $0xa8] sm:$0xff] }
  0x25   :  { %v182_v14 = vld [vmem:[#allocation2 + $0xb8] sm:$0xff]  ;;  %v513_v15 = vpack.c.bf16 %v177_v10, %v175_v9  ;;  %v493_v16 = vpack.c.bf16 %v72_v12, %v70_v7  ;;  %v179_v18 = vld [vmem:[#allocation2 + $0xa0] sm:$0xff]  ;;  %v181_v19 = vld [vmem:[#allocation2 + $0xb0] sm:$0xff] }
  0x26   :  { %506 = vmatpush1.bf16.msra.mxu1 %v505_v57  ;;  %v515_v17 = vpack.c.bf16 %v182_v14, %v180_v13  ;;  %v184_v20 = vld [vmem:[#allocation2 + $0xc8] sm:$0xff]  ;;  %v186_v21 = vld [vmem:[#allocation2 + $0xd8] sm:$0xff]  ;;  %v517_v22 = vpack.c.bf16 %v181_v19, %v179_v18  ;;  %v41_v23 = vld [vmem:[%s917_s0] sm:$0x1] }
  0x27   :  { %482 = vmatpush1.bf16.msra.mxu0 %v481_v46  ;;  %508 = vmatprep.subr.bf16.mxu1 %v507_v60  ;;  %v519_v24 = vpack.c.bf16 %v186_v21, %v184_v20  ;;  %v183_v25 = vld [vmem:[#allocation2 + $0xc0] sm:$0xff]  ;;  %v185_v26 = vld [vmem:[#allocation2 + $0xd0] sm:$0xff]  ;;  %v188_v27 = vld [vmem:[#allocation2 + $0xe8] sm:$0xff] }
  0x28   :  { %484 = vmatprep.subr.bf16.mxu0 %v483_v51  ;;  %v190_v28 = vld [vmem:[#allocation2 + $0xf8] sm:$0xff]  ;;  %v521_v29 = vpack.c.bf16 %v185_v26, %v183_v25  ;;  %v187_v31 = vld [vmem:[#allocation2 + $0xe0] sm:$0xff]  ;;  %v189_v32 = vld [vmem:[#allocation2 + $0xf0] sm:$0xff] }
  0x29   :  { %v523_v30 = vpack.c.bf16 %v190_v28, %v188_v27  ;;  %v192_v33 = vld [vmem:[#allocation2 + $0x108] sm:$0xff]  ;;  %v194_v34 = vld [vmem:[#allocation2 + $0x118] sm:$0xff]  ;;  %v525_v35 = vpack.c.bf16 %v189_v32, %v187_v31  ;;  %v191_v37 = vld [vmem:[#allocation2 + $0x100] sm:$0xff] }
  0x2a   :  { %510 = vmatpush1.bf16.msra.mxu1 %v509_v5  ;;  %v527_v36 = vpack.c.bf16 %v194_v34, %v192_v33  ;;  %v193_v38 = vld [vmem:[#allocation2 + $0x110] sm:$0xff]  ;;  %v196_v39 = vld [vmem:[#allocation2 + $0x128] sm:$0xff]  ;;  %v198_v40 = vld [vmem:[#allocation2 + $0x138] sm:$0xff] }
  0x2b   :  { %486 = vmatpush1.bf16.msra.mxu0 %v485_v58  ;;  %512 = vmatprep.subr.bf16.mxu1 %v511_v8  ;;  %v529_v41 = vpack.c.bf16 %v193_v38, %v191_v37  ;;  %v531_v42 = vpack.c.bf16 %v198_v40, %v196_v39  ;;  %v195_v43 = vld [vmem:[#allocation2 + $0x120] sm:$0xff]  ;;  %v197_v44 = vld [vmem:[#allocation2 + $0x130] sm:$0xff]  ;;  %v200_v45 = vld [vmem:[#allocation2 + $0x148] sm:$0xff] }
  0x2c   :  { %488 = vmatprep.subr.bf16.mxu0 %v487_v63  ;;  %v202_v46 = vld [vmem:[#allocation2 + $0x158] sm:$0xff]  ;;  %v533_v47 = vpack.c.bf16 %v197_v44, %v195_v43  ;;  %v199_v49 = vld [vmem:[#allocation2 + $0x140] sm:$0xff]  ;;  %v201_v50 = vld [vmem:[#allocation2 + $0x150] sm:$0xff] }
  0x2d   :  { %v535_v48 = vpack.c.bf16 %v202_v46, %v200_v45  ;;  %v204_v51 = vld [vmem:[#allocation2 + $0x168] sm:$0xff]  ;;  %v206_v52 = vld [vmem:[#allocation2 + $0x178] sm:$0xff]  ;;  %v537_v53 = vpack.c.bf16 %v201_v50, %v199_v49  ;;  %v203_v55 = vld [vmem:[#allocation2 + $0x160] sm:$0xff] }
  0x2e   :  { %514 = vmatpush1.bf16.msra.mxu1 %v513_v15  ;;  %v539_v54 = vpack.c.bf16 %v206_v52, %v204_v51  ;;  %v205_v56 = vld [vmem:[#allocation2 + $0x170] sm:$0xff]  ;;  %v208_v57 = vld [vmem:[#allocation2 + $0x188] sm:$0xff]  ;;  %v210_v58 = vld [vmem:[#allocation2 + $0x198] sm:$0xff] }
  0x2f   :  { %490 = vmatpush1.bf16.msra.mxu0 %v489_v6  ;;  %516 = vmatprep.subr.bf16.mxu1 %v515_v17  ;;  %v541_v59 = vpack.c.bf16 %v205_v56, %v203_v55  ;;  %v543_v60 = vpack.c.bf16 %v210_v58, %v208_v57  ;;  %v207_v61 = vld [vmem:[#allocation2 + $0x180] sm:$0xff]  ;;  %v209_v62 = vld [vmem:[#allocation2 + $0x190] sm:$0xff]  ;;  %v212_v63 = vld [vmem:[#allocation2 + $0x1a8] sm:$0xff]  ;;  %v76_v57 = vlaneseq }
  0x30   :  { %492 = vmatprep.subr.bf16.mxu0 %v491_v11  ;;  %v214_v0 = vld [vmem:[#allocation2 + $0x1b8] sm:$0xff]  ;;  %v545_v1 = vpack.c.bf16 %v209_v62, %v207_v61  ;;  %v211_v3 = vld [vmem:[#allocation2 + $0x1a0] sm:$0xff]  ;;  %v213_v4 = vld [vmem:[#allocation2 + $0x1b0] sm:$0xff] }
  0x31   :  { %v547_v2 = vpack.c.bf16 %v214_v0, %v212_v63  ;;  %v216_v5 = vld [vmem:[#allocation2 + $0x1c8] sm:$0xff]  ;;  %v218_v6 = vld [vmem:[#allocation2 + $0x1d8] sm:$0xff]  ;;  %v549_v7 = vpack.c.bf16 %v213_v4, %v211_v3  ;;  %v215_v9 = vld [vmem:[#allocation2 + $0x1c0] sm:$0xff]  ;;  %v77_v58 = vshrl.u32 %v76_v57, 7 }
  0x32   :  { %518 = vmatpush1.bf16.msra.mxu1 %v517_v22  ;;  %v551_v8 = vpack.c.bf16 %v218_v6, %v216_v5  ;;  %v217_v10 = vld [vmem:[#allocation2 + $0x1d0] sm:$0xff]  ;;  %v220_v12 = vld [vmem:[#allocation2 + $0x1e8] sm:$0xff]  ;;  %v222_v13 = vld [vmem:[#allocation2 + $0x1f8] sm:$0xff] }
  0x33   :  { %494 = vmatpush1.bf16.msra.mxu0 %v493_v16  ;;  %520 = vmatprep.subr.bf16.mxu1 %v519_v24  ;;  %v553_v11 = vpack.c.bf16 %v217_v10, %v215_v9  ;;  %v555_v14 = vpack.c.bf16 %v222_v13, %v220_v12  ;;  %v219_v15 = vld [vmem:[#allocation2 + $0x1e0] sm:$0xff]  ;;  %v221_v16 = vld [vmem:[#allocation2 + $0x1f0] sm:$0xff]  ;;  %v325_v19 = vld [vmem:[%s922_s5 + $0x88] sm:$0xff]  ;;  %v82_v61 = vsub.s32 1, %v77_v58 }
  0x34   :  { %v557_v17 = vpack.c.bf16 %v221_v16, %v219_v15  ;;  %v324_v18 = vld [vmem:[%s922_s5 + $0x80] sm:$0xff]  ;;  %v309_v22 = vld [vmem:[%s922_s5 + $0x8] sm:$0xff]  ;;  %v327_v24 = vld [vmem:[%s922_s5 + $0x98] sm:$0xff] }
  0x35   :  { %v308_v20 = vld [vmem:[%s922_s5] sm:$0xff]  ;;  %v559_v21 = vpack.c.bf16 %v325_v19, %v324_v18  ;;  %v310_v27 = vld [vmem:[%s922_s5 + $0x10] sm:$0xff]  ;;  %v311_v28 = vld [vmem:[%s922_s5 + $0x18] sm:$0xff] }
  0x36   :  { %151 = vmatmul.mubr.f32.vlgmr.msra.gmra.mrb[0].mxu0 %v41_v23  ;;  %522 = vmatpush1.bf16.msra.mxu1 %v521_v29  ;;  %v326_v23 = vld [vmem:[%s922_s5 + $0x90] sm:$0xff]  ;;  %v561_v25 = vpack.c.bf16 %v309_v22, %v308_v20  ;;  %v328_v29 = vld [vmem:[%s922_s5 + $0xa0] sm:$0xff]  ;;  %v565_v31 = vpack.c.bf16 %v311_v28, %v310_v27  ;;  %v313_v34 = vld [vmem:[%s922_s5 + $0x28] sm:$0xff] }
  0x37   :  { %524 = vmatprep.subr.bf16.mxu1 %v523_v30  ;;  %v563_v26 = vpack.c.bf16 %v327_v24, %v326_v23  ;;  %560 = vmatprep.subr.bf16.mxu0 %v559_v21  ;;  %v329_v30 = vld [vmem:[%s922_s5 + $0xa8] sm:$0xff]  ;;  %v312_v33 = vld [vmem:[%s922_s5 + $0x20] sm:$0xff]  ;;  %v314_v39 = vld [vmem:[%s922_s5 + $0x30] sm:$0xff] }
  0x38   :  { %562 = vmatpush3.bf16.msra.mxu0 %v561_v25  ;;  %v567_v32 = vpack.c.bf16 %v329_v30, %v328_v29  ;;  %v569_v37 = vpack.c.bf16 %v313_v34, %v312_v33  ;;  %v315_v40 = vld [vmem:[%s922_s5 + $0x38] sm:$0xff]  ;;  %v316_v45 = vld [vmem:[%s922_s5 + $0x40] sm:$0xff]  ;;  %v317_v46 = vld [vmem:[%s922_s5 + $0x48] sm:$0xff] }
  0x39   :  { %564 = vmatprep.subr.bf16.mxu0 %v563_v26  ;;  %v573_v43 = vpack.c.bf16 %v315_v40, %v314_v39  ;;  %v577_v49 = vpack.c.bf16 %v317_v46, %v316_v45  ;;  %v318_v51 = vld [vmem:[%s922_s5 + $0x50] sm:$0xff]  ;;  %v319_v52 = vld [vmem:[%s922_s5 + $0x58] sm:$0xff]  ;;  %v320_v6 = vld [vmem:[%s922_s5 + $0x60] sm:$0xff] }
  0x3a   :  { %526 = vmatpush1.bf16.msra.mxu1 %v525_v35  ;;  %v330_v35 = vld [vmem:[%s922_s5 + $0xb0] sm:$0xff]  ;;  %v581_v55 = vpack.c.bf16 %v319_v52, %v318_v51  ;;  %v339_v10 = vld [vmem:[%s922_s5 + $0xf8] sm:$0xff]  ;;  %v223_v15 = vld [vmem:[%s921_s4] sm:$0x3]  ;;  %s618_s4 = scalar_lea.vmem %s420_s23, 16 }
  0x3b   :  { %528 = vmatprep.subr.bf16.mxu1 %v527_v36  ;;  %v331_v36 = vld [vmem:[%s922_s5 + $0xb8] sm:$0xff]  ;;  %v338_v9 = vld [vmem:[%s922_s5 + $0xf0] sm:$0xff]  ;;  %v340_v25 = vld [vmem:[%s923_s6] sm:$0x1]  ;;  %p619_p8 = scmp.ne.s32.totalorder %s420_s23, %s618_s4  ;;  %p624_p10 = scmp.lt.s32.totalorder %s622_s24, %s618_s4 }
  0x3c   :  { %566 = vmatpush3.bf16.msra.mxu0 %v565_v31  ;;  %v571_v38 = vpack.c.bf16 %v331_v36, %v330_v35  ;;  %v322_v12 = vld [vmem:[%s922_s5 + $0x70] sm:$0xff]  ;;  %v323_v13 = vld [vmem:[%s922_s5 + $0x78] sm:$0xff] }
  0x3d   :  { %568 = vmatprep.subr.bf16.mxu0 %v567_v32  ;;  %p625_p11 = por %p624_p10, %p623_p9 }
  0x3e   :  { %530 = vmatpush1.bf16.msra.mxu1 %v529_v41  ;;  %v332_v41 = vld [vmem:[%s922_s5 + $0xc0] sm:$0xff] }
  0x3f   :  { %532 = vmatprep.subr.bf16.mxu1 %v531_v42  ;;  %v333_v42 = vld [vmem:[%s922_s5 + $0xc8] sm:$0xff]  ;;  %p626_p12 = pnand %p625_p11, %p619_p8 }
  0x40   :  { %570 = vmatpush3.bf16.msra.mxu0 %v569_v37  ;;  %v575_v44 = vpack.c.bf16 %v333_v42, %v332_v41 }
  0x41   :  { %572 = vmatprep.subr.bf16.mxu0 %v571_v38 }
  0x42   :  { %534 = vmatpush1.bf16.msra.mxu1 %v533_v47  ;;  %v334_v47 = vld [vmem:[%s922_s5 + $0xd0] sm:$0xff] }
  0x43   :  { %536 = vmatprep.subr.bf16.mxu1 %v535_v48  ;;  %v335_v48 = vld [vmem:[%s922_s5 + $0xd8] sm:$0xff] }
  0x44   :  { %574 = vmatpush3.bf16.msra.mxu0 %v573_v43  ;;  %v579_v50 = vpack.c.bf16 %v335_v48, %v334_v47 }
  0x45   :  { %576 = vmatprep.subr.bf16.mxu0 %v575_v44 }
  0x46   :  { %538 = vmatpush1.bf16.msra.mxu1 %v537_v53  ;;  %v336_v53 = vld [vmem:[%s922_s5 + $0xe0] sm:$0xff] }
  0x47   :  { %540 = vmatprep.subr.bf16.mxu1 %v539_v54  ;;  %v337_v54 = vld [vmem:[%s922_s5 + $0xe8] sm:$0xff] }
  0x48   :  { %578 = vmatpush3.bf16.msra.mxu0 %v577_v49  ;;  %v583_v56 = vpack.c.bf16 %v337_v54, %v336_v53 }
  0x49   :  { %580 = vmatprep.subr.bf16.mxu0 %v579_v50 }
  0x4a   :  { %542 = vmatpush1.bf16.msra.mxu1 %v541_v59  ;;  %v78_v59 = vsub.s32 0, %v77_v58 }
  0x4b   :  { %544 = vmatprep.subr.bf16.mxu1 %v543_v60  ;;  %v74_v60 = vld [vmem:[%s919_s2] sm:$0x3] }
  0x4c   :  { %582 = vmatpush3.bf16.msra.mxu0 %v581_v55  ;;  %v79_v62 = vrot.slane %v74_v60, %v78_v59  ;;  %v83_v63 = vrot.slane %v74_v60, %v82_v61  ;;  %v228_v16 = vrot.slane %v223_v15, %v78_v59 }
  0x4d   :  { %584 = vmatprep.subr.bf16.mxu0 %v583_v56 }
  0x4e   :  { %546 = vmatpush1.bf16.msra.mxu1 %v545_v1 }
  0x4f   :  { %548 = vmatprep.subr.bf16.mxu1 %v547_v2 }
  0x52   :  { %550 = vmatpush1.bf16.msra.mxu1 %v549_v7  ;;  %v321_v7 = vld [vmem:[%s922_s5 + $0x68] sm:$0xff] }
  0x53   :  { %552 = vmatprep.subr.bf16.mxu1 %v551_v8  ;;  %v585_v8 = vpack.c.bf16 %v321_v7, %v320_v6 }
  0x55   :  { %586 = vmatpush3.bf16.msra.mxu0 %v585_v8 }
  0x56   :  { %554 = vmatpush1.bf16.msra.mxu1 %v553_v11  ;;  %v587_v11 = vpack.c.bf16 %v339_v10, %v338_v9 }
  0x57   :  { %556 = vmatprep.subr.bf16.mxu1 %v555_v14  ;;  %v589_v14 = vpack.c.bf16 %v323_v13, %v322_v12 }
  0x58   :  { %588 = vmatprep.subr.bf16.mxu0 %v587_v11 }
  0x59   :  { %590 = vmatpush3.bf16.msra.mxu0 %v589_v14 }
  0x5a   :  { %558 = vmatpush1.bf16.msra.mxu1 %v557_v17  ;;  %v232_v17 = vrot.slane %v223_v15, %v82_v61 }
 0x109   :  { %v152_v0 = vpop.f32.mrb[0].mxu0 }
 0x10a   :  { %v153_v1 = vadd.f32 %v152_v0, %v79_v62  ;;  %v154_v2 = vpop.f32.mrb[1].mxu0 }
 0x10b   :  { %v155_v3 = vadd.f32 %v154_v2, %v83_v63 }
 0x10c   :  { %v157_v5 = vmax.f32 %v153_v1, 0.0 }
 0x10d   :  { %v158_v4 = vmax.f32 %v155_v3, 0.0 }
 0x10f   :  { %299 = vmatprep.mubr.f32.mxu1 %v158_v4 }
 0x110   :  { %300 = vmatmul.mubr.f32.vlgmr.msra.gmra.mrb[0].mxu1 %v157_v5 }
 0x1e3   :  { %v301_v18 = vpop.f32.mrb[0].mxu1 }
 0x1e4   :  { %v302_v19 = vadd.f32 %v301_v18, %v228_v16  ;;  %v303_v20 = vpop.f32.mrb[1].mxu1 }
 0x1e5   :  { %v304_v21 = vadd.f32 %v303_v20, %v232_v17 }
 0x1e6   :  { %v306_v23 = vmax.f32 %v302_v19, 0.0 }
 0x1e7   :  { %v307_v22 = vmax.f32 %v304_v21, 0.0 }
 0x1e9   :  { %405 = vmatprep.mubr.f32.mxu0 %v307_v22 }
 0x1ea   :  { %406 = vmatmul.mubr.f32.vlgmr.msra.gmra.mrb[2].mxu0 %v306_v23 }
 0x2bd   :  { %v460_v24 = vpop.f32.mrb[2].mxu0 }
 0x2be   :  { %v461_v26 = vpop.f32.mrb[3].mxu0 }
 0x2bf   :  { %v462_v27 = vadd.f32 %v461_v26, %v460_v24 }
 0x2c1   :  { %v408_v28 = vadd.f32 %v462_v27, %v340_v25 }
 0x2c3   :  { %412 = vst.msk [vmem:[#allocation5] sm:$0x1] %vm411_vm0, %v408_v28 }
 0x2c4   :  { %629 = shalt.err (!%p626_p12)
}
 0x2c5   :  { %s630_s6 = scalar_lea.hbm %s924_s7, 16 }
 0x2c6   :  { %p631_p13 = scmp.ne.s32.totalorder %s924_s7, %s630_s6  ;;  %p634_p0 = scmp.lt.u32.totalorder %s630_s6, %s924_s7 }
 0x2c8   :  { %p636_p1 = pnand %p634_p0, %p631_p13 }
 0x2ca   :  { %639 = shalt.err (!%p636_p1)
}
 0x2cb   :  { %422 = dma.vmem_to_hbm [thread:$0]  %s420_s23, 16, %s924_s7, [#allocation4]  }
 0x2cc   :  { %642 = dma.done.wait [#allocation4], 16  }
 0x2cd   :  { %643 = vsyncadd [#allocation4], 4294967280 }
 0x2ce   :  { %426 = vsyncpa [#allocation3], 1 }
 0x2cf   :  { %427 = vsyncpa [#allocation4], 1 }

</bundles_post_ra>
